<compile_context>
chip_gen: v5e
topology: v5e:2x2
jax: 0.10.0
libtpu: 0.0.40
codegen_flags: <defaults>
</compile_context>

<pallas_src>
import jax
import jax.numpy as jnp
import numpy as np
from jax.experimental import pallas as pl
from jax.experimental.pallas import tpu as pltpu


TB = 8  # sequences per grid step (one full sublane group of output rows)


def encoder_kernel(w_ref, rows_ref, out_ref):
    """Weighted bag-of-embeddings for a tile of TB sequences.

    w_ref:    (TB, L, 1) f32   per-token weights (pre-normalized or uniform)
    rows_ref: (TB, L, D)       gathered embedding rows
    out_ref:  (TB, D)          per-sequence weighted sum
    """
    acc = jnp.sum(w_ref[...] * rows_ref[...].astype(jnp.float32), axis=1)
    out_ref[...] = acc.astype(out_ref.dtype)


def encoder_forward(xs, emb_table, freqs=None):
    """xs: (B, L) int token ids; emb_table: (V, D); freqs: (V,) or None.

    For B == 1 and freqs is not None this matches the PyTorch forward exactly;
    B > 1 scores many sequences/candidates per call (each row normalized
    independently), which is how the kvmemnn workload uses the encoder.
    """
    B, L = xs.shape
    V, D = emb_table.shape

    toks = jnp.clip(xs.astype(jnp.int32), 0, V - 1)        # guard OOB ids
    rows = emb_table[toks]                                 # (B, L, D) gather in wrapper

    if freqs is not None:
        w = freqs[toks].astype(jnp.float32)                # (B, L)
        w = w / jnp.linalg.norm(w, axis=1, keepdims=True)  # per-row L2 norm
    else:
        # mean over the sequence axis == uniform weights 1/L
        w = jnp.full((B, L), 1.0 / L, dtype=jnp.float32)

    # Pad batch to a multiple of TB so every output store is a dense (8, 128) tile.
    B_pad = ((B + TB - 1) // TB) * TB
    if B_pad != B:
        rows = jnp.pad(rows, ((0, B_pad - B), (0, 0), (0, 0)))
        w = jnp.pad(w, ((0, B_pad - B), (0, 0)))
    w = w[:, :, None]                                      # (B_pad, L, 1)

    out = pl.pallas_call(
        encoder_kernel,
        out_shape=jax.ShapeDtypeStruct((B_pad, D), emb_table.dtype),
        grid=(B_pad // TB,),
        in_specs=[
            pl.BlockSpec((TB, L, 1), lambda b: (b, 0, 0)),   # weights
            pl.BlockSpec((TB, L, D), lambda b: (b, 0, 0)),   # gathered rows
        ],
        out_specs=pl.BlockSpec((TB, D), lambda b: (b, 0)),
        compiler_params=pltpu.CompilerParams(
            dimension_semantics=("parallel",)),
    )(w, rows)
    return out[:B]


def encoder_reference_freqs(xs, emb_table, freqs):
    """Pure-JAX transcription of the PyTorch forward (freqs path, batch 1)."""
    xs_emb = emb_table[xs]                       # (1, L, D)
    w = freqs[xs[0]]                             # (L,)
    w = w / jnp.linalg.norm(w)
    return (xs_emb[0].T @ w[:, None]).T          # (1, D)


def encoder_reference_mean(xs, emb_table):
    """Pure-JAX transcription of the PyTorch forward (freqs is None path)."""
    return emb_table[xs].mean(axis=1)            # (B, D)


if __name__ == "__main__":
    key = jax.random.PRNGKey(0)
    k_emb, k_freq, k_tok, k_tok2 = jax.random.split(key, 4)

    V = 64     # vocab size (len(dict))
    D = 128    # embedding size
    L = 8      # sequence length

    # shared_lt: nn.Embedding(V, D) weights, deterministic init (f32 to match torch)
    emb_table = jax.random.normal(k_emb, (V, D), dtype=jnp.float32) * 0.1

    # freqs[i] = 1 / (1 + log(1 + freq_i)) with synthetic integer word counts
    word_counts = jax.random.randint(k_freq, (V,), 1, 1000).astype(jnp.float32)
    freqs = 1.0 / (1.0 + jnp.log(1.0 + word_counts))

    # 1) batch-1 forward, freqs path — exactly the PyTorch module semantics
    xs1 = jax.random.randint(k_tok, (1, L), 0, V, dtype=jnp.int32)
    out1 = jax.block_until_ready(encoder_forward(xs1, emb_table, freqs))
    ref1 = encoder_reference_freqs(xs1, emb_table, freqs)
    np.testing.assert_allclose(np.asarray(out1), np.asarray(ref1),
                               rtol=1e-5, atol=1e-5)

    # 2) batched candidate scoring (16 sequences in one pallas_call)
    B = 16
    xs_b = jax.random.randint(k_tok2, (B, L), 0, V, dtype=jnp.int32)
    out_b = jax.block_until_ready(encoder_forward(xs_b, emb_table, freqs))
    ref_b = jnp.concatenate(
        [encoder_reference_freqs(xs_b[i:i + 1], emb_table, freqs)
         for i in range(B)], axis=0)
    np.testing.assert_allclose(np.asarray(out_b), np.asarray(ref_b),
                               rtol=1e-5, atol=1e-5)

    # 3) freqs is None path: plain mean over the sequence axis
    out_m = jax.block_until_ready(encoder_forward(xs_b, emb_table, None))
    ref_m = encoder_reference_mean(xs_b, emb_table)
    np.testing.assert_allclose(np.asarray(out_m), np.asarray(ref_m),
                               rtol=1e-5, atol=1e-5)

    print("KERNEL_OK")
</pallas_src>

<mosaic_0001>
module attributes {stable_mosaic.version = 11 : i64} {
  func.func @encoder_kernel(%arg0: i32, %arg1: memref<8x8x1xf32, #tpu.memory_space<vmem>>, %arg2: memref<8x8x128xf32, #tpu.memory_space<vmem>>, %arg3: memref<8x128xf32, #tpu.memory_space<vmem>>) attributes {dimension_semantics = [#tpu.dimension_semantics<parallel>], iteration_bounds = array<i64: 1>, scalar_prefetch = 0 : i64, scratch_operands = 0 : i64, tpu.core_type = #tpu.core_type<tc>, window_params = [{transform_indices = @transform_0, window_bounds = array<i64: 8, 8, 1>}, {transform_indices = @transform_1, window_bounds = array<i64: 8, 8, 128>}, {transform_indices = @transform_2, window_bounds = array<i64: 8, 128>}]} {
    %c0 = arith.constant 0 : index
    %c0_0 = arith.constant 0 : index
    %c0_1 = arith.constant 0 : index
    %0 = vector.load %arg1[%c0, %c0_0, %c0_1] : memref<8x8x1xf32, #tpu.memory_space<vmem>>, vector<8x8x1xf32>
    %c0_2 = arith.constant 0 : index
    %c0_3 = arith.constant 0 : index
    %c0_4 = arith.constant 0 : index
    %1 = vector.load %arg2[%c0_2, %c0_3, %c0_4] : memref<8x8x128xf32, #tpu.memory_space<vmem>>, vector<8x8x128xf32>
    %2 = vector.broadcast %0 : vector<8x8x1xf32> to vector<8x8x128xf32>
    %3 = arith.mulf %2, %1 : vector<8x8x128xf32>
    %cst = arith.constant dense<0.000000e+00> : vector<8x128xf32>
    %4 = vector.multi_reduction <add>, %3, %cst [1] : vector<8x8x128xf32> to vector<8x128xf32>
    %c0_5 = arith.constant 0 : index
    %c0_6 = arith.constant 0 : index
    %5 = vector.load %arg3[%c0_5, %c0_6] : memref<8x128xf32, #tpu.memory_space<vmem>>, vector<8x128xf32>
    tpu.vector_store %arg3[%c0_5, %c0_6], %4 {strides = array<i32>} : memref<8x128xf32, #tpu.memory_space<vmem>>, vector<8x128xf32>,
    return
  }
  func.func @transform_0(%arg0: i32) -> (i32, i32, i32) {
    %c0_i32 = arith.constant 0 : i32
    %c0_i32_0 = arith.constant 0 : i32
    %c0_i32_1 = arith.constant 0 : i32
    return %arg0, %c0_i32, %c0_i32_0 : i32, i32, i32
  }
  func.func @transform_1(%arg0: i32) -> (i32, i32, i32) {
    %c0_i32 = arith.constant 0 : i32
    %c0_i32_0 = arith.constant 0 : i32
    %c0_i32_1 = arith.constant 0 : i32
    return %arg0, %c0_i32, %c0_i32_0 : i32, i32, i32
  }
  func.func @transform_2(%arg0: i32) -> (i32, i32) {
    %c0_i32 = arith.constant 0 : i32
    %c0_i32_0 = arith.constant 0 : i32
    return %arg0, %c0_i32 : i32, i32
  }
}

</mosaic_0001>

<bundles_post_ra>
// kernel: tpu_custom_call.1
= control target key start
LH: loop header
LB: loop body
LE: loop exit
PB: predicated region body
PF: predicated region fallthrough
CT: control target
= control target key end

     0   :  { %v195_v2 = vmov 0   ;;  %s263_s0 = inlined_call_operand.vmem [shape: f32[8,8,1], index: 0, kind: input, shape index: {}]   ;;  %s264_s1 = inlined_call_operand.vmem [shape: f32[8,8,128], index: 1, kind: input, shape index: {}]   ;;  %s265_s2 = inlined_call_operand.hbm [shape: f32[8,128], index: 2, kind: output, shape index: {}]  }
   0x1   :  { %v14_v0 = vld [vmem:[%s263_s0 + $0x10] sm:$0xff]  ;;  %v12_v1 = vld [vmem:[%s263_s0] sm:$0xff]  ;;  %167 = vset.pattern.permute.xlu1 %v195_v2  ;;  %166 = vset.pattern.permute.xlu0 %v195_v2 }
   0x2   :  { %40 = vperm.xlu1 %167, %v14_v0   ;;  %30 = vperm.xlu0 %166, %v12_v1   ;;  %v16_v3 = vld [vmem:[%s263_s0 + $0x20] sm:$0xff] }
   0x3   :  { %168 = vset.pattern.permute.xlu2 %v195_v2 }
   0x4   :  { %7 = vsyncpa [#allocation3], 0  ;;  %50 = vperm.xlu2 %168, %v16_v3   ;;  %v15_v4 = vld [vmem:[%s263_s0 + $0x18] sm:$0xff]  ;;  %v13_v5 = vld [vmem:[%s263_s0 + $0x8] sm:$0xff]  ;;  %vm132_vm0 = vcmask 1041409   ;;  %vm134_vm1 = vcmask 1042434  }
   0x5   :  { %v17_v6 = vld [vmem:[%s263_s0 + $0x28] sm:$0xff]  ;;  %v19_v7 = vld [vmem:[%s263_s0 + $0x38] sm:$0xff]  ;;  %v18_v8 = vld [vmem:[%s263_s0 + $0x30] sm:$0xff]  ;;  %vm136_vm2 = vcmask 1043459   ;;  %vm138_vm3 = vcmask 1044484   ;;  %vm140_vm4 = vcmask 1045509  }
   0x6   :  { %v24_v10 = vld [vmem:[%s264_s1 + $0x20] sm:$0xff]  ;;  %v22_v11 = vld [vmem:[%s264_s1 + $0x10] sm:$0xff]  ;;  %v25_v18 = vld [vmem:[%s264_s1 + $0x28] sm:$0xff]  ;;  %vm142_vm5 = vcmask 1046534   ;;  %s155_s15 = sshll.u32 %s265_s2, 4  ;;  %vm144_vm6 = vcmask 1047559   ;;  %s156_s15 = int_to_ptr.hbm [resolvable:$true] %s155_s15 }
   0x7   :  { %v20_v12 = vld [vmem:[%s264_s1] sm:$0xff]  ;;  %v23_v26 = vld [vmem:[%s264_s1 + $0x18] sm:$0xff]  ;;  %v21_v27 = vld [vmem:[%s264_s1 + $0x8] sm:$0xff] }
   0x8   :  { %v27_v44 = vld [vmem:[%s264_s1 + $0x38] sm:$0xff]  ;;  %v26_v45 = vld [vmem:[%s264_s1 + $0x30] sm:$0xff]  ;;  %s196_s1 = smov [#allocation2]  }
   0x9   :  { %s153_s12 = sshll.u32 %s196_s1, 4  ;;  %s154_s12 = int_to_ptr.vmem [resolvable:$true] %s153_s12 }
   0xa   :  { %45 = vperm.xlu1 %167, %v15_v4   ;;  %35 = vperm.xlu0 %166, %v13_v5  }
   0xc   :  { %55 = vperm.xlu2 %168, %v17_v6  }
  0x12   :  { %65 = vperm.xlu1 %167, %v19_v7   ;;  %60 = vperm.xlu0 %166, %v18_v8  }
  0x5e   :  { %v51_v9 = vpop.permute.xlu2 %50 }
  0x5f   :  { %v72_v13 = vmul.f32 %v51_v9, %v24_v10 }
  0x61   :  { %v100_v22 = vrot.slane %v72_v13, 4 }
  0x63   :  { %v101_v28 = vadd.f32 %v100_v22, %v72_v13 }
  0x65   :  { %v102_v38 = vrot.slane %v101_v28, 2 }
  0x66   :  { %v56_v19 = vpop.permute.xlu2 %55 }
  0x67   :  { %v73_v23 = vmul.f32 %v56_v19, %v25_v18  ;;  %v103_v48 = vadd.f32 %v102_v38, %v101_v28 }
  0x69   :  { %v106_v30 = vrot.slane %v73_v23, 4  ;;  %v104_v62 = vrot.slane %v103_v48, 1 }
  0x6b   :  { %v107_v40 = vadd.f32 %v106_v30, %v73_v23 }
  0x6d   :  { %v108_v50 = vrot.slane %v107_v40, 2 }
  0x6f   :  { %v109_v63 = vadd.f32 %v108_v50, %v107_v40 }
  0x71   :  { %v110_v9 = vrot.slane %v109_v63, 1 }
  0x73   :  { %v111_v18 = vadd.f32 %v110_v9, %v109_v63 }
  0x74   :  { %v41_v14 = vpop.permute.xlu1 %40  ;;  %v31_v15 = vpop.permute.xlu0 %30 }
  0x75   :  { %v70_v16 = vmul.f32 %v41_v14, %v22_v11  ;;  %v68_v17 = vmul.f32 %v31_v15, %v20_v12  ;;  %v105_v11 = vadd.f32 %v104_v62, %v103_v48 }
  0x77   :  { %v88_v20 = vrot.slane %v70_v16, 4  ;;  %v76_v21 = vrot.slane %v68_v17, 4 }
  0x79   :  { %v77_v24 = vadd.f32 %v76_v21, %v68_v17  ;;  %v89_v25 = vadd.f32 %v88_v20, %v70_v16 }
  0x7b   :  { %v78_v29 = vrot.slane %v77_v24, 2  ;;  %v90_v35 = vrot.slane %v89_v25, 2 }
  0x7c   :  { %v46_v31 = vpop.permute.xlu1 %45  ;;  %v36_v32 = vpop.permute.xlu0 %35 }
  0x7d   :  { %v71_v33 = vmul.f32 %v46_v31, %v23_v26  ;;  %v69_v34 = vmul.f32 %v36_v32, %v21_v27  ;;  %v79_v39 = vadd.f32 %v78_v29, %v77_v24  ;;  %v91_v43 = vadd.f32 %v90_v35, %v89_v25 }
  0x7f   :  { %v94_v36 = vrot.slane %v71_v33, 4  ;;  %v82_v37 = vrot.slane %v69_v34, 4  ;;  %v80_v49 = vrot.slane %v79_v39, 1  ;;  %v92_v57 = vrot.slane %v91_v43, 1 }
  0x81   :  { %v95_v41 = vadd.f32 %v94_v36, %v71_v33  ;;  %v83_v42 = vadd.f32 %v82_v37, %v69_v34  ;;  %v81_v0 = vadd.f32 %v80_v49, %v79_v39  ;;  %v93_v4 = vadd.f32 %v92_v57, %v91_v43 }
  0x83   :  { %v96_v46 = vrot.slane %v95_v41, 2  ;;  %v84_v47 = vrot.slane %v83_v42, 2 }
  0x84   :  { %v66_v51 = vpop.permute.xlu1 %65  ;;  %v61_v52 = vpop.permute.xlu0 %60 }
  0x85   :  { %v97_v53 = vadd.f32 %v96_v46, %v95_v41  ;;  %v85_v54 = vadd.f32 %v84_v47, %v83_v42  ;;  %v75_v55 = vmul.f32 %v66_v51, %v27_v44  ;;  %v74_v56 = vmul.f32 %v61_v52, %v26_v45 }
  0x87   :  { %v98_v58 = vrot.slane %v97_v53, 1  ;;  %v86_v59 = vrot.slane %v85_v54, 1  ;;  %v118_v60 = vrot.slane %v75_v55, 4  ;;  %v112_v61 = vrot.slane %v74_v56, 4 }
  0x89   :  { %v87_v1 = vadd.f32 %v86_v59, %v85_v54  ;;  %v119_v2 = vadd.f32 %v118_v60, %v75_v55  ;;  %v113_v3 = vadd.f32 %v112_v61, %v74_v56  ;;  %v99_v5 = vadd.f32 %v98_v58, %v97_v53 }
  0x8b   :  { %v133_v6 = vsel %vm132_vm0, %v87_v1, %v81_v0  ;;  %v120_v7 = vrot.slane %v119_v2, 2  ;;  %v114_v8 = vrot.slane %v113_v3, 2 }
  0x8c   :  { %v135_v10 = vsel %vm134_vm1, %v93_v4, %v133_v6 }
  0x8d   :  { %v121_v12 = vadd.f32 %v120_v7, %v119_v2  ;;  %v115_v13 = vadd.f32 %v114_v8, %v113_v3  ;;  %v137_v14 = vsel %vm136_vm2, %v99_v5, %v135_v10 }
  0x8e   :  { %v139_v17 = vsel %vm138_vm3, %v105_v11, %v137_v14 }
  0x8f   :  { %v122_v15 = vrot.slane %v121_v12, 1  ;;  %v116_v16 = vrot.slane %v115_v13, 1  ;;  %v141_v21 = vsel %vm140_vm4, %v111_v18, %v139_v17 }
  0x91   :  { %v123_v19 = vadd.f32 %v122_v15, %v121_v12  ;;  %v117_v20 = vadd.f32 %v116_v16, %v115_v13 }
  0x93   :  { %v143_v22 = vsel %vm142_vm5, %v117_v20, %v141_v21 }
  0x94   :  { %v145_v23 = vsel %vm144_vm6, %v123_v19, %v143_v22 }
  0x95   :  { %147 = vst [vmem:[#allocation2] sm:$0xff] %v145_v23 }
  0x96   :  { %158 = dma.vmem_to_hbm [thread:$0]  %s154_s12, 128, %s156_s15, [#allocation3]  }
  0x97   :  { %193 = dma.done.wait [#allocation3], 128  }
  0x98   :  { %194 = vsyncadd [#allocation3], 4294967168 }
  0x99   :  { %163 = vsyncpa [#allocation3], 1 }

</bundles_post_ra>
